<compile_context>
chip_gen: v6e
topology: v6e:2x2x1
jax: 0.10.0
libtpu: 0.0.40
codegen_flags: <defaults>
</compile_context>

<pallas_src>
import jax
import jax.numpy as jnp
from jax.experimental import pallas as pl
from jax.experimental.pallas import tpu as pltpu


def _round_up(n, m):
    return ((n + m - 1) // m) * m


def _full_hybrid_kernel(xim_ref, wc_ref, bc_ref, wa_ref, ba_ref, we_ref, be_ref,
                        cls_ref, attr_ref):
    # xim_ref : (b_tile, H*W, 9*C_in)  bf16  im2col patches (lane-dense last dim)
    # wc_ref  : (9*C_in, C_feat)       bf16  conv taps flattened (kh, kw, c_in major)
    # bc_ref  : (1, C_feat)            f32
    # wa_ref  : (C_feat, NPC)          f32   concept heads, zero-padded to NPC lanes
    # ba_ref  : (1, NPC)               f32
    # we_ref  : (NPC, NPY)             f32   end model, zero-padded rows/cols
    # be_ref  : (1, NPY)               f32
    # cls_ref : (1, b_tile, NPY)       f32   lane-dense padded outputs
    # attr_ref: (1, b_tile, NPC)       f32
    bt, hw, k = xim_ref.shape
    c_feat = wc_ref.shape[-1]

    # Single im2col matmul (K = 9*C_in) instead of nine tiny K=C_in dots.
    feat = jnp.dot(xim_ref[...].reshape(bt * hw, k), wc_ref[...],
                   preferred_element_type=jnp.float32)        # (bt*hw, C_feat) f32
    feat = jnp.maximum(feat + bc_ref[...], 0.0)               # bias + ReLU, in place

    # Global average pool per image (XLU reduction + constant 1/HW multiply).
    pooled = jnp.sum(feat.reshape(bt, hw, c_feat), axis=1) * (1.0 / hw)

    # Concept heads + sigmoid. Padded columns see wa=0, ba=0 -> sigmoid(0)=0.5,
    # which the zero-padded rows of we_ref cancel exactly in the class matmul.
    attrs = jax.nn.sigmoid(
        jnp.dot(pooled, wa_ref[...], preferred_element_type=jnp.float32) + ba_ref[...])

    # binarize_attr = False -> stage2_inputs = attr_outputs.
    # TODO(synk): binarize_attr=True branch (attr_outputs.where(x > 0.5, 1, 0))
    # compares attributes against the raw image tensor and has no clean
    # shape-consistent equivalent; not implemented.
    cls = jnp.dot(attrs, we_ref[...], preferred_element_type=jnp.float32) + be_ref[...]

    cls_ref[0] = cls.astype(cls_ref.dtype)
    attr_ref[0] = attrs.astype(attr_ref.dtype)


def _tpu_policy():
    """(data VMEM budget, vmem_limit_bytes, #TensorCores) by TPU generation."""
    kind = ""
    try:
        kind = jax.devices()[0].device_kind.lower()
    except Exception:
        pass
    if "v7" in kind:
        # v7x: 2 TensorCores / chip, only 64 MiB VMEM per TC -> keep headroom
        # and keep >= 2 grid steps so dimension_semantics=("parallel",) can
        # shard the grid across both cores.
        return {"budget": 24 << 20, "vmem_limit": 48 << 20, "num_tc": 2}
    # v5e / v6e: single TC, 128 MiB physical VMEM (default scoped limit is only
    # 16/32 MiB, so raise it explicitly) -> bigger tiles, no grid-step clamp.
    return {"budget": 40 << 20, "vmem_limit": 64 << 20, "num_tc": 1}


def _pick_b_tile(B, H, W, C_in, C_feat, budget, num_tc):
    hw = H * W
    # Tiled (post layout-padding) VMEM bytes per image, not logical bytes:
    #   bf16 im2col block, double-buffered: sublanes padded to 16, lanes to 128.
    im2col_bytes = 2 * _round_up(hw, 16) * _round_up(9 * C_in, 128) * 2
    #   f32 conv/feat intermediate (single live buffer; bias+ReLU in place).
    feat_bytes = _round_up(hw, 8) * _round_up(C_feat, 128) * 4
    per_img = im2col_bytes + feat_bytes
    bt = max(1, int(budget // per_img))
    bt = min(bt, 256)
    if num_tc >= 2 and B >= 2:
        bt = min(bt, max(1, B // num_tc))   # >= num_tc grid steps (v7x megacore)
    return max(1, min(bt, B))


def full_hybrid_model(x_nchw, params):
    """Forward pass.  x_nchw: [B, C_in, H, W] float32.
    Returns (class_outputs [B, n_classes], attr_outputs [B, n_concepts])."""
    wc, bc, wa, ba, we, be = (params[k] for k in ("wc", "bc", "wa", "ba", "we", "be"))
    B, C_in, H, W = x_nchw.shape
    C_feat = wc.shape[-1]
    n_concepts = wa.shape[1]
    n_classes = we.shape[1]
    npc = _round_up(max(n_concepts, 1), 128)   # lane-dense concept width
    npy = _round_up(max(n_classes, 1), 128)    # lane-dense class width

    pol = _tpu_policy()
    b_tile = _pick_b_tile(B, H, W, C_in, C_feat, pol["budget"], pol["num_tc"])
    num_tiles = pl.cdiv(B, b_tile)
    B_pad = num_tiles * b_tile

    # Glue: NCHW -> NHWC, batch pad, "same" spatial pad, build im2col patches
    # in HBM (only ~9x of a few-KiB input) with a lane-dense 9*C_in last dim,
    # cast the streamed block + conv weight to bf16 (accumulation stays f32).
    x = jnp.transpose(x_nchw, (0, 2, 3, 1))
    xp = jnp.pad(x, ((0, B_pad - B), (1, 1), (1, 1), (0, 0)))
    taps = [xp[:, kh:kh + H, kw:kw + W, :] for kh in range(3) for kw in range(3)]
    xim = jnp.concatenate(taps, axis=-1).reshape(B_pad, H * W, 9 * C_in)
    xim = xim.astype(jnp.bfloat16)
    wc9 = wc.reshape(9 * C_in, C_feat).astype(jnp.bfloat16)

    # Zero-pad head/end weights to 128-wide N dims so matmuls and the output
    # stores are lane-dense; padded columns/rows contribute exactly zero.
    wa_p = jnp.zeros((C_feat, npc), jnp.float32).at[:, :n_concepts].set(wa)
    ba_p = jnp.zeros((1, npc), jnp.float32).at[:, :n_concepts].set(ba)
    we_p = jnp.zeros((npc, npy), jnp.float32).at[:n_concepts, :n_classes].set(we)
    be_p = jnp.zeros((1, npy), jnp.float32).at[:, :n_classes].set(be)

    cls3, attr3 = pl.pallas_call(
        _full_hybrid_kernel,
        out_shape=(
            jax.ShapeDtypeStruct((num_tiles, b_tile, npy), jnp.float32),
            jax.ShapeDtypeStruct((num_tiles, b_tile, npc), jnp.float32),
        ),
        grid_spec=pltpu.PrefetchScalarGridSpec(
            num_scalar_prefetch=0,
            grid=(num_tiles,),
            in_specs=[
                pl.BlockSpec((b_tile, H * W, 9 * C_in), lambda t: (t, 0, 0)),
                pl.BlockSpec((9 * C_in, C_feat), lambda t: (0, 0)),
                pl.BlockSpec((1, C_feat), lambda t: (0, 0)),
                pl.BlockSpec((C_feat, npc), lambda t: (0, 0)),
                pl.BlockSpec((1, npc), lambda t: (0, 0)),
                pl.BlockSpec((npc, npy), lambda t: (0, 0)),
                pl.BlockSpec((1, npy), lambda t: (0, 0)),
            ],
            out_specs=[
                pl.BlockSpec((1, b_tile, npy), lambda t: (t, 0, 0)),
                pl.BlockSpec((1, b_tile, npc), lambda t: (t, 0, 0)),
            ],
        ),
        compiler_params=pltpu.CompilerParams(
            dimension_semantics=("parallel",),
            vmem_limit_bytes=pol["vmem_limit"]),
    )(xim, wc9, bc, wa_p, ba_p, we_p, be_p)

    cls = cls3.reshape(B_pad, npy)[:B, :n_classes]
    attrs = attr3.reshape(B_pad, npc)[:B, :n_concepts]
    return cls, attrs


def full_hybrid_model_ref(x_nchw, params):
    """Pure-JAX reference with the same bf16-input / f32-accumulate numerics."""
    wc, bc, wa, ba, we, be = (params[k] for k in ("wc", "bc", "wa", "ba", "we", "be"))
    B, C_in, H, W = x_nchw.shape
    C_feat = wc.shape[-1]
    x = jnp.transpose(x_nchw, (0, 2, 3, 1)).astype(jnp.bfloat16)
    xp = jnp.pad(x, ((0, 0), (1, 1), (1, 1), (0, 0)))
    wcb = wc.astype(jnp.bfloat16)
    acc = jnp.zeros((B, H, W, C_feat), jnp.float32)
    for kh in range(3):
        for kw in range(3):
            acc = acc + jnp.einsum("bhwc,cf->bhwf",
                                   xp[:, kh:kh + H, kw:kw + W, :], wcb[kh, kw],
                                   preferred_element_type=jnp.float32)
    feat = jnp.maximum(acc + bc, 0.0)
    pooled = jnp.mean(feat, axis=(1, 2))
    attrs = jax.nn.sigmoid(pooled @ wa + ba)
    cls = attrs @ we + be
    return cls, attrs


def make_params(key, C_in=4, C_feat=32, n_concepts=8, n_classes=5):
    ks = jax.random.split(key, 6)
    return {
        "wc": jax.random.normal(ks[0], (3, 3, C_in, C_feat), jnp.float32) * 0.1,
        "bc": jax.random.normal(ks[1], (1, C_feat), jnp.float32) * 0.1,
        "wa": jax.random.normal(ks[2], (C_feat, n_concepts), jnp.float32) * 0.1,
        "ba": jax.random.normal(ks[3], (1, n_concepts), jnp.float32) * 0.1,
        "we": jax.random.normal(ks[4], (n_concepts, n_classes), jnp.float32) * 0.1,
        "be": jax.random.normal(ks[5], (1, n_classes), jnp.float32) * 0.1,
    }


if __name__ == "__main__":
    key = jax.random.PRNGKey(0)
    kx, kp = jax.random.split(key)

    B, C_in, H, W = 2, 4, 16, 16
    x = jax.random.normal(kx, (B, C_in, H, W), jnp.float32)
    params = make_params(kp, C_in=C_in)

    fwd = jax.jit(full_hybrid_model)
    cls_out, attrs = jax.block_until_ready(fwd(x, params))

    cls_ref, attrs_ref = full_hybrid_model_ref(x, params)
    # Both paths use bf16 conv inputs with f32 accumulation; tolerance covers
    # accumulation-order differences only.
    assert cls_out.shape == (B, 5) and attrs.shape == (B, 8)
    assert jnp.allclose(cls_out, cls_ref, atol=1e-3, rtol=1e-3)
    assert jnp.allclose(attrs, attrs_ref, atol=1e-3, rtol=1e-3)

    print("KERNEL_OK")
</pallas_src>

<mosaic_0001>
module attributes {stable_mosaic.version = 11 : i64} {
  func.func @_full_hybrid_kernel(%arg0: i32, %arg1: memref<2x256x36xbf16, #tpu.memory_space<vmem>>, %arg2: memref<36x32xbf16, #tpu.memory_space<vmem>>, %arg3: memref<1x32xf32, #tpu.memory_space<vmem>>, %arg4: memref<32x128xf32, #tpu.memory_space<vmem>>, %arg5: memref<1x128xf32, #tpu.memory_space<vmem>>, %arg6: memref<128x128xf32, #tpu.memory_space<vmem>>, %arg7: memref<1x128xf32, #tpu.memory_space<vmem>>, %arg8: memref<1x2x128xf32, #tpu.memory_space<vmem>>, %arg9: memref<1x2x128xf32, #tpu.memory_space<vmem>>) attributes {dimension_semantics = [#tpu.dimension_semantics<parallel>], iteration_bounds = array<i64: 1>, scalar_prefetch = 0 : i64, scratch_operands = 0 : i64, tpu.core_type = #tpu.core_type<tc>, window_params = [{transform_indices = @transform_0, window_bounds = array<i64: 2, 256, 36>}, {pipeline_mode = #tpu.pipeline_mode<synchronous>, transform_indices = @transform_1, window_bounds = array<i64: 36, 32>}, {pipeline_mode = #tpu.pipeline_mode<synchronous>, transform_indices = @transform_2, window_bounds = array<i64: 1, 32>}, {pipeline_mode = #tpu.pipeline_mode<synchronous>, transform_indices = @transform_3, window_bounds = array<i64: 32, 128>}, {pipeline_mode = #tpu.pipeline_mode<synchronous>, transform_indices = @transform_4, window_bounds = array<i64: 1, 128>}, {pipeline_mode = #tpu.pipeline_mode<synchronous>, transform_indices = @transform_5, window_bounds = array<i64: 128, 128>}, {pipeline_mode = #tpu.pipeline_mode<synchronous>, transform_indices = @transform_6, window_bounds = array<i64: 1, 128>}, {transform_indices = @transform_7, window_bounds = array<i64: 1, 2, 128>}, {transform_indices = @transform_8, window_bounds = array<i64: 1, 2, 128>}]} {
    %c0 = arith.constant 0 : index
    %c0_0 = arith.constant 0 : index
    %c0_1 = arith.constant 0 : index
    %0 = vector.load %arg1[%c0, %c0_0, %c0_1] : memref<2x256x36xbf16, #tpu.memory_space<vmem>>, vector<2x256x36xbf16>
    %1 = vector.shape_cast %0 : vector<2x256x36xbf16> to vector<512x36xbf16>
    %c0_2 = arith.constant 0 : index
    %c0_3 = arith.constant 0 : index
    %2 = vector.load %arg2[%c0_2, %c0_3] : memref<36x32xbf16, #tpu.memory_space<vmem>>, vector<36x32xbf16>
    %cst = arith.constant dense<0.000000e+00> : vector<512x32xf32>
    %3 = tpu.matmul %1, %2, %cst {dimension_numbers = #tpu.dot_dimension_numbers<[1], [0], [0], [1], [0, 0, 1, 1], [], []>} : vector<512x36xbf16>, vector<36x32xbf16>, vector<512x32xf32> -> vector<512x32xf32>
    %c0_4 = arith.constant 0 : index
    %c0_5 = arith.constant 0 : index
    %4 = vector.load %arg3[%c0_4, %c0_5] : memref<1x32xf32, #tpu.memory_space<vmem>>, vector<1x32xf32>
    %5 = vector.broadcast %4 : vector<1x32xf32> to vector<512x32xf32>
    %6 = arith.addf %3, %5 : vector<512x32xf32>
    %cst_6 = arith.constant 0.000000e+00 : f32
    %7 = vector.broadcast %cst_6 : f32 to vector<512x32xf32>
    %8 = arith.maximumf %6, %7 : vector<512x32xf32>
    %9 = vector.shape_cast %8 : vector<512x32xf32> to vector<2x256x32xf32>
    %cst_7 = arith.constant dense<0.000000e+00> : vector<2x32xf32>
    %10 = vector.multi_reduction <add>, %9, %cst_7 [1] : vector<2x256x32xf32> to vector<2x32xf32>
    %cst_8 = arith.constant 3.906250e-03 : f32
    %11 = vector.broadcast %cst_8 : f32 to vector<2x32xf32>
    %12 = arith.mulf %10, %11 : vector<2x32xf32>
    %c0_9 = arith.constant 0 : index
    %c0_10 = arith.constant 0 : index
    %13 = vector.load %arg4[%c0_9, %c0_10] : memref<32x128xf32, #tpu.memory_space<vmem>>, vector<32x128xf32>
    %cst_11 = arith.constant dense<0.000000e+00> : vector<2x128xf32>
    %14 = tpu.matmul %12, %13, %cst_11 {dimension_numbers = #tpu.dot_dimension_numbers<[1], [0], [0], [1], [0, 0, 1, 1], [], []>} : vector<2x32xf32>, vector<32x128xf32>, vector<2x128xf32> -> vector<2x128xf32>
    %c0_12 = arith.constant 0 : index
    %c0_13 = arith.constant 0 : index
    %15 = vector.load %arg5[%c0_12, %c0_13] : memref<1x128xf32, #tpu.memory_space<vmem>>, vector<1x128xf32>
    %16 = vector.broadcast %15 : vector<1x128xf32> to vector<2x128xf32>
    %17 = arith.addf %14, %16 : vector<2x128xf32>
    %18 = arith.negf %17 : vector<2x128xf32>
    %19 = math.exp %18 : vector<2x128xf32>
    %cst_14 = arith.constant 1.000000e+00 : f32
    %20 = vector.broadcast %cst_14 : f32 to vector<2x128xf32>
    %21 = arith.addf %20, %19 : vector<2x128xf32>
    %22 = arith.divf %20, %21 : vector<2x128xf32>
    %c0_15 = arith.constant 0 : index
    %c0_16 = arith.constant 0 : index
    %23 = vector.load %arg6[%c0_15, %c0_16] : memref<128x128xf32, #tpu.memory_space<vmem>>, vector<128x128xf32>
    %cst_17 = arith.constant dense<0.000000e+00> : vector<2x128xf32>
    %24 = tpu.matmul %22, %23, %cst_17 {dimension_numbers = #tpu.dot_dimension_numbers<[1], [0], [0], [1], [0, 0, 1, 1], [], []>} : vector<2x128xf32>, vector<128x128xf32>, vector<2x128xf32> -> vector<2x128xf32>
    %c0_18 = arith.constant 0 : index
    %c0_19 = arith.constant 0 : index
    %25 = vector.load %arg7[%c0_18, %c0_19] : memref<1x128xf32, #tpu.memory_space<vmem>>, vector<1x128xf32>
    %26 = vector.broadcast %25 : vector<1x128xf32> to vector<2x128xf32>
    %27 = arith.addf %24, %26 : vector<2x128xf32>
    %c0_20 = arith.constant 0 : index
    %c0_21 = arith.constant 0 : index
    %c0_22 = arith.constant 0 : index
    %28 = vector.load %arg8[%c0_20, %c0_21, %c0_22] : memref<1x2x128xf32, #tpu.memory_space<vmem>>, vector<1x2x128xf32>
    %29 = vector.shape_cast %28 : vector<1x2x128xf32> to vector<2x128xf32>
    %30 = vector.shape_cast %27 : vector<2x128xf32> to vector<1x2x128xf32>
    tpu.vector_store %arg8[%c0_20, %c0_21, %c0_22], %30 {strides = array<i32>} : memref<1x2x128xf32, #tpu.memory_space<vmem>>, vector<1x2x128xf32>,
    %c0_23 = arith.constant 0 : index
    %c0_24 = arith.constant 0 : index
    %c0_25 = arith.constant 0 : index
    %31 = vector.load %arg9[%c0_23, %c0_24, %c0_25] : memref<1x2x128xf32, #tpu.memory_space<vmem>>, vector<1x2x128xf32>
    %32 = vector.shape_cast %31 : vector<1x2x128xf32> to vector<2x128xf32>
    %33 = vector.shape_cast %22 : vector<2x128xf32> to vector<1x2x128xf32>
    tpu.vector_store %arg9[%c0_23, %c0_24, %c0_25], %33 {strides = array<i32>} : memref<1x2x128xf32, #tpu.memory_space<vmem>>, vector<1x2x128xf32>,
    return
  }
  func.func @transform_0(%arg0: i32) -> (i32, i32, i32) {
    %c0_i32 = arith.constant 0 : i32
    %c0_i32_0 = arith.constant 0 : i32
    %c0_i32_1 = arith.constant 0 : i32
    return %arg0, %c0_i32, %c0_i32_0 : i32, i32, i32
  }
  func.func @transform_1(%arg0: i32) -> (i32, i32) {
    %c0_i32 = arith.constant 0 : i32
    %c0_i32_0 = arith.constant 0 : i32
    %c0_i32_1 = arith.constant 0 : i32
    return %c0_i32, %c0_i32_0 : i32, i32
  }
  func.func @transform_2(%arg0: i32) -> (i32, i32) {
    %c0_i32 = arith.constant 0 : i32
    %c0_i32_0 = arith.constant 0 : i32
    %c0_i32_1 = arith.constant 0 : i32
    return %c0_i32, %c0_i32_0 : i32, i32
  }
  func.func @transform_3(%arg0: i32) -> (i32, i32) {
    %c0_i32 = arith.constant 0 : i32
    %c0_i32_0 = arith.constant 0 : i32
    %c0_i32_1 = arith.constant 0 : i32
    return %c0_i32, %c0_i32_0 : i32, i32
  }
  func.func @transform_4(%arg0: i32) -> (i32, i32) {
    %c0_i32 = arith.constant 0 : i32
    %c0_i32_0 = arith.constant 0 : i32
    %c0_i32_1 = arith.constant 0 : i32
    return %c0_i32, %c0_i32_0 : i32, i32
  }
  func.func @transform_5(%arg0: i32) -> (i32, i32) {
    %c0_i32 = arith.constant 0 : i32
    %c0_i32_0 = arith.constant 0 : i32
    %c0_i32_1 = arith.constant 0 : i32
    return %c0_i32, %c0_i32_0 : i32, i32
  }
  func.func @transform_6(%arg0: i32) -> (i32, i32) {
    %c0_i32 = arith.constant 0 : i32
    %c0_i32_0 = arith.constant 0 : i32
    %c0_i32_1 = arith.constant 0 : i32
    return %c0_i32, %c0_i32_0 : i32, i32
  }
  func.func @transform_7(%arg0: i32) -> (i32, i32, i32) {
    %c0_i32 = arith.constant 0 : i32
    %c0_i32_0 = arith.constant 0 : i32
    %c0_i32_1 = arith.constant 0 : i32
    return %arg0, %c0_i32, %c0_i32_0 : i32, i32, i32
  }
  func.func @transform_8(%arg0: i32) -> (i32, i32, i32) {
    %c0_i32 = arith.constant 0 : i32
    %c0_i32_0 = arith.constant 0 : i32
    %c0_i32_1 = arith.constant 0 : i32
    return %arg0, %c0_i32, %c0_i32_0 : i32, i32, i32
  }
}

</mosaic_0001>

<bundles_post_ra>
// kernel: full_hybrid_model.1
= control target key start
LH: loop header
LB: loop body
LE: loop exit
PB: predicated region body
PF: predicated region fallthrough
CT: control target
= control target key end

     0   :  { %14 = vsyncpa [#allocation3], 0  ;;  %vm379_vm0 = vcmask 1041408   ;;  %vm282_vm1 = vcmask 293888   ;;  %s1880_s0 = inlined_call_operand.vmem [shape: bf16[2,256,36], index: 0, kind: input, shape index: {}]   ;;  %s1881_s1 = inlined_call_operand.vmem [shape: bf16[36,32], index: 1, kind: input, shape index: {}]   ;;  %s1882_s2 = inlined_call_operand.vmem [shape: f32[1,32], index: 2, kind: input, shape index: {}]   ;;  %s1883_s3 = inlined_call_operand.vmem [shape: f32[32,128], index: 3, kind: input, shape index: {}]   ;;  %s1884_s4 = inlined_call_operand.vmem [shape: f32[1,128], index: 4, kind: input, shape index: {}]   ;;  %s1885_s5 = inlined_call_operand.vmem [shape: f32[128,128], index: 5, kind: input, shape index: {}]   ;;  %s1886_s6 = inlined_call_operand.vmem [shape: f32[1,128], index: 6, kind: input, shape index: {}]   ;;  %s1887_s7 = inlined_call_operand.hbm [shape: f32[1,2,128], index: 7, kind: output, shape index: {0}]   ;;  %s1888_s8 = inlined_call_operand.hbm [shape: f32[1,2,128], index: 8, kind: output, shape index: {1}]  }
   0x1   :  { %v1350_v0 = vld [vmem:[%s1881_s1 + $0x10] ss:$0 sps:$4 sm:$0x33]   ;;  %v1351_v1 = vld [vmem:[%s1881_s1 + $0x8] sm:$0xff]   ;;  %v1353_v3 = vld [vmem:[%s1880_s0] sm:$0xff]  }
   0x2   :  { %1344 = vmatprep.subr.msk.bf16.mxu0 %vm379_vm0, %v1350_v0  ;;  %v381_v2 = vsel %vm379_vm0, %v1350_v0, 0  ;;  %1345 = vmatprep.subr.msk.bf16.mxu1 %vm379_vm0, %v1350_v0  ;;  %v1352_v4 = vld [vmem:[%s1881_s1] sm:$0xff]   ;;  %v1354_v5 = vld [vmem:[%s1880_s0 + $0x8] sm:$0xff]   ;;  %v1355_v6 = vld [vmem:[%s1880_s0 + $0x10] sm:$0xff]  }
   0x3   :  { %1223 = vmatpush3.bf16.msra.mxu0 %v381_v2  ;;  %1341 = vmatpush3.bf16.msra.mxu1 %v381_v2  ;;  %v1356_v7 = vld [vmem:[%s1880_s0 + $0x18] sm:$0xff]   ;;  %v1357_v8 = vld [vmem:[%s1880_s0 + $0x20] sm:$0xff]   ;;  %v1358_v9 = vld [vmem:[%s1880_s0 + $0x28] sm:$0xff]  }
   0x4   :  { %1224 = vmatprep.subr.bf16.mxu0 %v1351_v1  ;;  %1339 = vmatprep.subr.bf16.mxu1 %v1351_v1  ;;  %v1359_v10 = vld [vmem:[%s1880_s0 + $0x30] sm:$0xff]   ;;  %v1376_v12 = vld [vmem:[%s1880_s0 + $0xb8] sm:$0xff]   ;;  %v1377_v13 = vld [vmem:[%s1880_s0 + $0xc0] sm:$0xff]  }
   0x5   :  { %1228 = vmatprep.mubr.msk.bf16.mxu0 %vm282_vm1, %v1353_v3  ;;  %v1375_v11 = vld [vmem:[%s1880_s0 + $0xb0] sm:$0xff]   ;;  %v1378_v14 = vld [vmem:[%s1880_s0 + $0xc8] sm:$0xff]   ;;  %v1360_v16 = vld [vmem:[%s1880_s0 + $0x38] sm:$0xff]  }
   0x6   :  { %1272 = vmatprep.mubr.msk.bf16.mxu1 %vm282_vm1, %v1375_v11  ;;  %v1379_v15 = vld [vmem:[%s1880_s0 + $0xd0] sm:$0xff]   ;;  %v1361_v17 = vld [vmem:[%s1880_s0 + $0x40] sm:$0xff]  }
   0x7   :  { %1225 = vmatpush3.bf16.msra.mxu0 %v1351_v1  ;;  %1342 = vmatpush3.bf16.msra.mxu1 %v1351_v1 }
   0x8   :  { %1226 = vmatprep.subr.bf16.mxu0 %v1352_v4  ;;  %1340 = vmatprep.subr.bf16.mxu1 %v1352_v4 }
   0xb   :  { %1227 = vmatpush3.bf16.msra.mxu0 %v1352_v4  ;;  %1343 = vmatpush3.bf16.msra.mxu1 %v1352_v4 }
   0xe   :  { %1229 = vmatmul.mubr.msk.bf16.vlgmr.msra.gmra.mxu0 %vm282_vm1, %v1354_v5  ;;  %1273 = vmatmul.mubr.msk.bf16.vlgmr.msra.gmra.mxu1 %vm282_vm1, %v1376_v12 }
   0xf   :  { %1232 = vmatprep.mubr.msk.bf16.mxu0 %vm282_vm1, %v1355_v6  ;;  %1276 = vmatprep.mubr.msk.bf16.mxu1 %vm282_vm1, %v1377_v13 }
  0x16   :  { %1233 = vmatmul.mubr.msk.bf16.gmra.mxu0 %vm282_vm1, %v1356_v7 }
  0x17   :  { %1236 = vmatprep.mubr.msk.bf16.mxu0 %vm282_vm1, %v1357_v8 }
  0x1e   :  { %1237 = vmatmul.mubr.msk.bf16.gmra.mxu0 %vm282_vm1, %v1358_v9 }
  0x1f   :  { %1240 = vmatprep.mubr.msk.bf16.mxu0 %vm282_vm1, %v1359_v10 }
  0x20   :  { %15 = vsyncpa [#allocation5], 0  ;;  %1277 = vmatmul.mubr.msk.bf16.gmra.mxu1 %vm282_vm1, %v1378_v14  ;;  %v1380_v18 = vld [vmem:[%s1880_s0 + $0xd8] sm:$0xff]   ;;  %v1381_v19 = vld [vmem:[%s1880_s0 + $0xe0] sm:$0xff]   ;;  %v1433_v37 = vmov 0.0   ;;  %vm736_vm2 = vcmask 261120  }
  0x21   :  { %1280 = vmatprep.mubr.msk.bf16.mxu1 %vm282_vm1, %v1379_v15  ;;  %v1362_v20 = vld [vmem:[%s1880_s0 + $0x48] sm:$0xff]   ;;  %v1363_v21 = vld [vmem:[%s1880_s0 + $0x50] sm:$0xff]   ;;  %v1364_v24 = vld [vmem:[%s1880_s0 + $0x58] sm:$0xff]   ;;  %1292 = vmatprep.subr.mxu1 %v1433_v37  ;;  %vm1434_vm3 = vmmov 0   ;;  %vm890_vm4 = vcmask 1041409   ;;  %s1435_s20 = smov [#allocation4]  }
  0x22   :  { %v1382_v22 = vld [vmem:[%s1880_s0 + $0xe8] sm:$0xff]   ;;  %v1383_v23 = vld [vmem:[%s1880_s0 + $0xf0] sm:$0xff]   ;;  %v1365_v25 = vld [vmem:[%s1880_s0 + $0x60] sm:$0xff]   ;;  %s1081_s21 = sshll.u32 %s1435_s20, 4  ;;  %s1082_s21 = int_to_ptr.vmem [resolvable:$true] %s1081_s21 }
  0x23   :  { %v1384_v26 = vld [vmem:[%s1880_s0 + $0xf8] sm:$0xff]   ;;  %v1366_v27 = vld [vmem:[%s1880_s0 + $0x68] sm:$0xff]   ;;  %v1367_v28 = vld [vmem:[%s1880_s0 + $0x70] sm:$0xff]   ;;  %p1394_p1 = scmp.lt.s32.totalorder %s1082_s21, %s1082_s21 }
  0x24   :  { %v1368_v29 = vld [vmem:[%s1880_s0 + $0x78] sm:$0xff]   ;;  %v1369_v30 = vld [vmem:[%s1880_s0 + $0x80] sm:$0xff]   ;;  %v1370_v31 = vld [vmem:[%s1880_s0 + $0x88] sm:$0xff]  }
  0x25   :  { %v1371_v32 = vld [vmem:[%s1880_s0 + $0x90] sm:$0xff]   ;;  %v1372_v33 = vld [vmem:[%s1880_s0 + $0x98] sm:$0xff]   ;;  %v1373_v34 = vld [vmem:[%s1880_s0 + $0xa0] sm:$0xff]  }
  0x26   :  { %1241 = vmatmul.mubr.msk.bf16.gmra.mxu0 %vm282_vm1, %v1360_v16  ;;  %v1374_v35 = vld [vmem:[%s1880_s0 + $0xa8] sm:$0xff]   ;;  %v880_v36 = vld [vmem:[%s1883_s3 + $0x18] sm:$0xff]  ;;  %v1627_v39 = vld [vmem:[%s1882_s2] ss:$0 sm:$0xff] }
  0x27   :  { %1244 = vmatprep.mubr.msk.bf16.mxu0 %vm282_vm1, %v1361_v17  ;;  %1293 = vmatpush3.msra.mxu1 %v880_v36  ;;  %v879_v9 = vld [vmem:[%s1883_s3 + $0x10] sm:$0xff]  ;;  %v878_v10 = vld [vmem:[%s1883_s3 + $0x8] sm:$0xff]  ;;  %v877_v16 = vld [vmem:[%s1883_s3] sm:$0xff] }
  0x28   :  { %1281 = vmatmul.mubr.msk.bf16.gmra.mxu1 %vm282_vm1, %v1380_v18  ;;  %1294 = vmatprep.subr.mxu1 %v1433_v37 }
  0x29   :  { %1284 = vmatprep.mubr.msk.bf16.mxu1 %vm282_vm1, %v1381_v19  ;;  %1295 = vmatpush3.msra.mxu1 %v879_v9 }
  0x2a   :  { %1296 = vmatprep.subr.mxu1 %v1433_v37 }
  0x2b   :  { %1297 = vmatpush3.msra.mxu1 %v878_v10 }
  0x2c   :  { %1298 = vmatprep.subr.mxu1 %v1433_v37 }
  0x2d   :  { %1299 = vmatpush3.msra.mxu1 %v877_v16 }
  0x2e   :  { %1245 = vmatmul.mubr.msk.bf16.gmra.mxu0 %vm282_vm1, %v1362_v20  ;;  %1303 = vmatprep.subr.mxu1 %v1433_v37 }
  0x2f   :  { %1248 = vmatprep.mubr.msk.bf16.mxu0 %vm282_vm1, %v1363_v21 }
  0x30   :  { %1285 = vmatmul.mubr.msk.bf16.gmra.mxu1 %vm282_vm1, %v1382_v22 }
  0x31   :  { %1288 = vmatprep.mubr.msk.bf16.mxu1 %vm282_vm1, %v1383_v23 }
  0x36   :  { %1249 = vmatmul.mubr.msk.bf16.gmra.mxu0 %vm282_vm1, %v1364_v24 }
  0x37   :  { %1252 = vmatprep.mubr.msk.bf16.mxu0 %vm282_vm1, %v1365_v25 }
  0x38   :  { %1289 = vmatmul.mubr.msk.bf16.gmra.mxu1 %vm282_vm1, %v1384_v26 }
  0x39   :  { %1300 = vmatprep.mubr.msk.f32.mxu1 %vm1434_vm3, %v1433_v37 }
  0x3e   :  { %1253 = vmatmul.mubr.msk.bf16.gmra.mxu0 %vm282_vm1, %v1366_v27 }
  0x3f   :  { %1256 = vmatprep.mubr.msk.bf16.mxu0 %vm282_vm1, %v1367_v28 }
  0x46   :  { %1257 = vmatmul.mubr.msk.bf16.gmra.mxu0 %vm282_vm1, %v1368_v29 }
  0x47   :  { %1260 = vmatprep.mubr.msk.bf16.mxu0 %vm282_vm1, %v1369_v30 }
  0x4e   :  { %1261 = vmatmul.mubr.msk.bf16.gmra.mxu0 %vm282_vm1, %v1370_v31 }
  0x4f   :  { %1264 = vmatprep.mubr.msk.bf16.mxu0 %vm282_vm1, %v1371_v32 }
  0x56   :  { %1265 = vmatmul.mubr.msk.bf16.gmra.mxu0 %vm282_vm1, %v1372_v33 }
  0x57   :  { %1268 = vmatprep.mubr.msk.bf16.mxu0 %vm282_vm1, %v1373_v34 }
  0x5e   :  { %1269 = vmatmul.mubr.msk.bf16.gmra.mxu0 %vm282_vm1, %v1374_v35 }
  0xce   :  { %v1230_v38 = vpop.f32.mrf.mxu0 }
  0xcf   :  { %v426_v43 = vadd.f32 %v1230_v38, %v1627_v39 }
  0xd0   :  { %v417_v40 = vpop.f32.mrf.mxu0 }
  0xd1   :  { %v418_v41 = vadd.f32 %v1627_v39, %v417_v40  ;;  %v674_v49 = vmax.f32 %v426_v43, 0.0 }
  0xd2   :  { %v1231_v42 = vpop.f32.mrf.mxu0 }
  0xd3   :  { %v672_v45 = vmax.f32 %v418_v41, 0.0  ;;  %v429_v46 = vadd.f32 %v1231_v42, %v1627_v39  ;;  %v740_v58 = vsel %vm736_vm2, %v674_v49, 0.0 }
  0xd4   :  { %v420_v44 = vpop.f32.mrf.mxu0 }
  0xd5   :  { %v421_v47 = vadd.f32 %v1627_v39, %v420_v44  ;;  %v737_v52 = vsel %vm736_vm2, %v672_v45, 0.0  ;;  %v675_v53 = vmax.f32 %v429_v46, 0.0 }
  0xd6   :  { %v1234_v48 = vpop.f32.mrf.mxu0 }
  0xd7   :  { %v673_v50 = vmax.f32 %v421_v47, 0.0  ;;  %v442_v59 = vadd.f32 %v1234_v48, %v1627_v39  ;;  %v742_v63 = vsel %vm736_vm2, %v675_v53, 0.0 }
  0xd8   :  { %v433_v51 = vpop.f32.mrf.mxu0 }
  0xd9   :  { %v738_v54 = vsel %vm736_vm2, %v673_v50, 0.0  ;;  %v434_v55 = vadd.f32 %v1627_v39, %v433_v51  ;;  %v678_v4 = vmax.f32 %v442_v59, 0.0 }
  0xda   :  { %v739_v56 = vadd.f32 %v738_v54, %v737_v52  ;;  %v1235_v57 = vpop.f32.mrf.mxu0 }
  0xdb   :  { %v676_v60 = vmax.f32 %v434_v55, 0.0  ;;  %v445_v0 = vadd.f32 %v1235_v57, %v1627_v39  ;;  %v748_v17 = vsel %vm736_vm2, %v678_v4, 0.0 }
  0xdc   :  { %v741_v61 = vadd.f32 %v740_v58, %v739_v56  ;;  %v436_v62 = vpop.f32.mrf.mxu0 }
  0xdd   :  { %v437_v1 = vadd.f32 %v1627_v39, %v436_v62  ;;  %v744_v5 = vsel %vm736_vm2, %v676_v60, 0.0  ;;  %v679_v11 = vmax.f32 %v445_v0, 0.0 }
  0xde   :  { %v743_v2 = vadd.f32 %v742_v63, %v741_v61  ;;  %v1238_v3 = vpop.f32.mrf.mxu0 }
  0xdf   :  { %v677_v6 = vmax.f32 %v437_v1, 0.0  ;;  %v458_v18 = vadd.f32 %v1238_v3, %v1627_v39  ;;  %v750_v22 = vsel %vm736_vm2, %v679_v11, 0.0 }
  0xe0   :  { %v745_v7 = vadd.f32 %v744_v5, %v743_v2  ;;  %v449_v8 = vpop.f32.mrf.mxu0 }
  0xe1   :  { %v746_v12 = vsel %vm736_vm2, %v677_v6, 0.0  ;;  %v450_v13 = vadd.f32 %v1627_v39, %v449_v8  ;;  %v682_v27 = vmax.f32 %v458_v18, 0.0 }
  0xe2   :  { %v747_v14 = vadd.f32 %v746_v12, %v745_v7  ;;  %v1239_v15 = vpop.f32.mrf.mxu0 }
  0xe3   :  { %v680_v19 = vmax.f32 %v450_v13, 0.0  ;;  %v461_v23 = vadd.f32 %v1239_v15, %v1627_v39  ;;  %v756_v38 = vsel %vm736_vm2, %v682_v27, 0.0  ;;  %v1682_v15 = vpop.f32.mrf.mxu1 }
  0xe4   :  { %v749_v20 = vadd.f32 %v748_v17, %v747_v14  ;;  %v452_v21 = vpop.f32.mrf.mxu0 }
  0xe5   :  { %v453_v24 = vadd.f32 %v1627_v39, %v452_v21  ;;  %v752_v28 = vsel %vm736_vm2, %v680_v19, 0.0  ;;  %v683_v32 = vmax.f32 %v461_v23, 0.0 }
  0xe6   :  { %v751_v25 = vadd.f32 %v750_v22, %v749_v20  ;;  %v1242_v26 = vpop.f32.mrf.mxu0 }
  0xe7   :  { %v681_v29 = vmax.f32 %v453_v24, 0.0  ;;  %v474_v40 = vadd.f32 %v1242_v26, %v1627_v39  ;;  %v758_v44 = vsel %vm736_vm2, %v683_v32, 0.0  ;;  %v1689_v26 = vpop.f32.mrf.mxu1 }
  0xe8   :  { %v753_v30 = vadd.f32 %v752_v28, %v751_v25  ;;  %v465_v31 = vpop.f32.mrf.mxu0 }
  0xe9   :  { %v754_v33 = vsel %vm736_vm2, %v681_v29, 0.0  ;;  %v466_v34 = vadd.f32 %v1627_v39, %v465_v31  ;;  %v686_v49 = vmax.f32 %v474_v40, 0.0 }
  0xea   :  { %v755_v35 = vadd.f32 %v754_v33, %v753_v30  ;;  %v1243_v36 = vpop.f32.mrf.mxu0 }
  0xeb   :  { %v684_v41 = vmax.f32 %v466_v34, 0.0  ;;  %v477_v45 = vadd.f32 %v1243_v36, %v1627_v39  ;;  %v764_v59 = vsel %vm736_vm2, %v686_v49, 0.0 }
  0xec   :  { %v757_v42 = vadd.f32 %v756_v38, %v755_v35  ;;  %v468_v43 = vpop.f32.mrf.mxu0  ;;  %v1694_v38 = vpop.f32.mrf.mxu1 }
  0xed   :  { %v469_v46 = vadd.f32 %v1627_v39, %v468_v43  ;;  %v760_v50 = vsel %vm736_vm2, %v684_v41, 0.0  ;;  %v687_v54 = vmax.f32 %v477_v45, 0.0 }
  0xee   :  { %v759_v47 = vadd.f32 %v758_v44, %v757_v42  ;;  %v1246_v48 = vpop.f32.mrf.mxu0 }
  0xef   :  { %v685_v51 = vmax.f32 %v469_v46, 0.0  ;;  %v490_v60 = vadd.f32 %v1246_v48, %v1627_v39  ;;  %v766_v0 = vsel %vm736_vm2, %v687_v54, 0.0 }
  0xf0   :  { %v761_v52 = vadd.f32 %v760_v50, %v759_v47  ;;  %v481_v53 = vpop.f32.mrf.mxu0  ;;  %v1701_v50 = vpop.f32.mrf.mxu1 }
  0xf1   :  { %v762_v55 = vsel %vm736_vm2, %v685_v51, 0.0  ;;  %v482_v56 = vadd.f32 %v1627_v39, %v481_v53  ;;  %v690_v5 = vmax.f32 %v490_v60, 0.0 }
  0xf2   :  { %v763_v57 = vadd.f32 %v762_v55, %v761_v52  ;;  %v1247_v58 = vpop.f32.mrf.mxu0 }
  0xf3   :  { %v688_v61 = vmax.f32 %v482_v56, 0.0  ;;  %v493_v1 = vadd.f32 %v1247_v58, %v1627_v39  ;;  %v772_v16 = vsel %vm736_vm2, %v690_v5, 0.0 }
  0xf4   :  { %v765_v62 = vadd.f32 %v764_v59, %v763_v57  ;;  %v484_v63 = vpop.f32.mrf.mxu0 }
  0xf5   :  { %v485_v2 = vadd.f32 %v1627_v39, %v484_v63  ;;  %v768_v6 = vsel %vm736_vm2, %v688_v61, 0.0  ;;  %v691_v10 = vmax.f32 %v493_v1, 0.0  ;;  %v1706_v61 = vpop.f32.mrf.mxu1 }
  0xf6   :  { %v767_v3 = vadd.f32 %v766_v0, %v765_v62  ;;  %v1250_v4 = vpop.f32.mrf.mxu0 }
  0xf7   :  { %v689_v7 = vmax.f32 %v485_v2, 0.0  ;;  %v506_v17 = vadd.f32 %v1250_v4, %v1627_v39  ;;  %v774_v21 = vsel %vm736_vm2, %v691_v10, 0.0 }
  0xf8   :  { %v769_v8 = vadd.f32 %v768_v6, %v767_v3  ;;  %v497_v9 = vpop.f32.mrf.mxu0 }
  0xf9   :  { %v770_v11 = vsel %vm736_vm2, %v689_v7, 0.0  ;;  %v498_v12 = vadd.f32 %v1627_v39, %v497_v9  ;;  %v694_v27 = vmax.f32 %v506_v17, 0.0 }
  0xfa   :  { %v771_v13 = vadd.f32 %v770_v11, %v769_v8  ;;  %v1251_v14 = vpop.f32.mrf.mxu0  ;;  %v1713_v8 = vpop.f32.mrf.mxu1 }
  0xfb   :  { %v692_v18 = vmax.f32 %v498_v12, 0.0  ;;  %v509_v22 = vadd.f32 %v1251_v14, %v1627_v39  ;;  %v780_v40 = vsel %vm736_vm2, %v694_v27, 0.0 }
  0xfc   :  { %v773_v19 = vadd.f32 %v772_v16, %v771_v13  ;;  %v500_v20 = vpop.f32.mrf.mxu0 }
  0xfd   :  { %v501_v23 = vadd.f32 %v1627_v39, %v500_v20  ;;  %v776_v28 = vsel %vm736_vm2, %v692_v18, 0.0  ;;  %v695_v32 = vmax.f32 %v509_v22, 0.0  ;;  %v1718_v20 = vpop.f32.mrf.mxu1 }
  0xfe   :  { %v775_v24 = vadd.f32 %v774_v21, %v773_v19  ;;  %v1254_v25 = vpop.f32.mrf.mxu0 }
  0xff   :  { %v693_v29 = vmax.f32 %v501_v23, 0.0  ;;  %v522_v41 = vadd.f32 %v1254_v25, %v1627_v39  ;;  %v782_v45 = vsel %vm736_vm2, %v695_v32, 0.0  ;;  %v1727_v32 = vpop.f32.mrf.mxu1 }
 0x100   :  { %v777_v30 = vadd.f32 %v776_v28, %v775_v24  ;;  %v513_v31 = vpop.f32.mrf.mxu0 }
 0x101   :  { %v778_v33 = vsel %vm736_vm2, %v693_v29, 0.0  ;;  %v514_v34 = vadd.f32 %v1627_v39, %v513_v31  ;;  %v698_v51 = vmax.f32 %v522_v41, 0.0 }
 0x102   :  { %v779_v35 = vadd.f32 %v778_v33, %v777_v30  ;;  %v1255_v36 = vpop.f32.mrf.mxu0 }
 0x103   :  { %v696_v42 = vmax.f32 %v514_v34, 0.0  ;;  %v525_v46 = vadd.f32 %v1255_v36, %v1627_v39  ;;  %v788_v62 = vsel %vm736_vm2, %v698_v51, 0.0 }
 0x104   :  { %v781_v43 = vadd.f32 %v780_v40, %v779_v35  ;;  %v516_v44 = vpop.f32.mrf.mxu0 }
 0x105   :  { %v517_v47 = vadd.f32 %v1627_v39, %v516_v44  ;;  %v784_v52 = vsel %vm736_vm2, %v696_v42, 0.0  ;;  %v699_v56 = vmax.f32 %v525_v46, 0.0 }
 0x106   :  { %v783_v48 = vadd.f32 %v782_v45, %v781_v43  ;;  %v1258_v49 = vpop.f32.mrf.mxu0  ;;  %v1732_v45 = vpop.f32.mrf.mxu1 }
 0x107   :  { %v697_v53 = vmax.f32 %v517_v47, 0.0  ;;  %v538_v63 = vadd.f32 %v1258_v49, %v1627_v39  ;;  %v790_v3 = vsel %vm736_vm2, %v699_v56, 0.0 }
 0x108   :  { %v785_v54 = vadd.f32 %v784_v52, %v783_v48  ;;  %v529_v55 = vpop.f32.mrf.mxu0 }
 0x109   :  { %v786_v57 = vsel %vm736_vm2, %v697_v53, 0.0  ;;  %v530_v58 = vadd.f32 %v1627_v39, %v529_v55  ;;  %v702_v9 = vmax.f32 %v538_v63, 0.0 }
 0x10a   :  { %v787_v59 = vadd.f32 %v786_v57, %v785_v54  ;;  %v1259_v60 = vpop.f32.mrf.mxu0  ;;  %v625_v57 = vpop.f32.mrf.mxu1 }
 0x10b   :  { %v700_v0 = vmax.f32 %v530_v58, 0.0  ;;  %v541_v4 = vadd.f32 %v1259_v60, %v1627_v39  ;;  %v796_v21 = vsel %vm736_vm2, %v702_v9, 0.0 }
 0x10c   :  { %v789_v1 = vadd.f32 %v788_v62, %v787_v59  ;;  %v532_v2 = vpop.f32.mrf.mxu0 }
 0x10d   :  { %v533_v5 = vadd.f32 %v1627_v39, %v532_v2  ;;  %v792_v10 = vsel %vm736_vm2, %v700_v0, 0.0  ;;  %v703_v14 = vmax.f32 %v541_v4, 0.0 }
 0x10e   :  { %v791_v6 = vadd.f32 %v790_v3, %v789_v1  ;;  %v1262_v7 = vpop.f32.mrf.mxu0 }
 0x10f   :  { %v701_v11 = vmax.f32 %v533_v5, 0.0  ;;  %v554_v22 = vadd.f32 %v1262_v7, %v1627_v39  ;;  %v798_v25 = vsel %vm736_vm2, %v703_v14, 0.0  ;;  %v1283_v5 = vpop.f32.mrf.mxu1 }
 0x110   :  { %v793_v12 = vadd.f32 %v792_v10, %v791_v6  ;;  %v545_v13 = vpop.f32.mrf.mxu0 }
 0x111   :  { %v794_v16 = vsel %vm736_vm2, %v701_v11, 0.0  ;;  %v546_v17 = vadd.f32 %v1627_v39, %v545_v13  ;;  %v706_v33 = vmax.f32 %v554_v22, 0.0 }
 0x112   :  { %v795_v18 = vadd.f32 %v794_v16, %v793_v12  ;;  %v1263_v19 = vpop.f32.mrf.mxu0 }
 0x113   :  { %v704_v27 = vmax.f32 %v546_v17, 0.0  ;;  %v557_v28 = vadd.f32 %v1263_v19, %v1627_v39  ;;  %v809_v46 = vsel %vm736_vm2, %v706_v33, 0.0  ;;  %v628_v17 = vpop.f32.mrf.mxu1  ;;  %v602_v33 = vadd.f32 %v1682_v15, %v1627_v39 }
 0x114   :  { %v797_v23 = vadd.f32 %v796_v21, %v795_v18  ;;  %v548_v24 = vpop.f32.mrf.mxu0  ;;  %v594_v21 = vadd.f32 %v1627_v39, %v1689_v26  ;;  %v605_v26 = vadd.f32 %v1694_v38, %v1627_v39 }
 0x115   :  { %v549_v29 = vadd.f32 %v1627_v39, %v548_v24  ;;  %v806_v36 = vsel %vm736_vm2, %v704_v27, 0.0  ;;  %v707_v40 = vmax.f32 %v557_v28, 0.0  ;;  %v597_v27 = vadd.f32 %v1627_v39, %v1701_v50 }
 0x116   :  { %v1725_v30 = vadd.f32 %v798_v25, %v797_v23  ;;  %v1266_v31 = vpop.f32.mrf.mxu0 }
 0x117   :  { %v705_v34 = vmax.f32 %v549_v29, 0.0  ;;  %v570_v47 = vadd.f32 %v1266_v31, %v1627_v39  ;;  %v811_v52 = vsel %vm736_vm2, %v707_v40, 0.0  ;;  %v1286_v29 = vpop.f32.mrf.mxu1  ;;  %v717_v40 = vmax.f32 %v597_v27, 0.0 }
 0x118   :  { %v561_v35 = vpop.f32.mrf.mxu0 }
 0x119   :  { %v807_v41 = vsel %vm736_vm2, %v705_v34, 0.0  ;;  %v562_v42 = vadd.f32 %v1627_v39, %v561_v35  ;;  %v710_v58 = vmax.f32 %v570_v47, 0.0  ;;  %v716_v34 = vmax.f32 %v594_v21, 0.0 }
 0x11a   :  { %v808_v43 = vadd.f32 %v807_v41, %v806_v36  ;;  %v1267_v44 = vpop.f32.mrf.mxu0  ;;  %v719_v47 = vmax.f32 %v605_v26, 0.0  ;;  %v831_v15 = vsel %vm736_vm2, %v717_v40, 0.0 }
 0x11b   :  { %v708_v48 = vmax.f32 %v562_v42, 0.0  ;;  %v573_v53 = vadd.f32 %v1267_v44, %v1627_v39  ;;  %v817_v6 = vsel %vm736_vm2, %v710_v58, 0.0  ;;  %v641_v42 = vpop.f32.mrf.mxu1  ;;  %v829_v50 = vsel %vm736_vm2, %v716_v34, 0.0 }
 0x11c   :  { %v810_v49 = vadd.f32 %v809_v46, %v808_v43  ;;  %v564_v51 = vpop.f32.mrf.mxu0  ;;  %v718_v43 = vmax.f32 %v602_v33, 0.0  ;;  %v610_v44 = vadd.f32 %v1627_v39, %v1713_v8  ;;  %v621_v8 = vadd.f32 %v1718_v20, %v1627_v39 }
 0x11d   :  { %v565_v54 = vadd.f32 %v1627_v39, %v564_v51  ;;  %v813_v59 = vsel %vm736_vm2, %v708_v48, 0.0  ;;  %v711_v0 = vmax.f32 %v573_v53, 0.0  ;;  %v613_v48 = vadd.f32 %v1627_v39, %v1727_v32  ;;  %v1287_v51 = vpop.f32.mrf.mxu1 }
 0x11e   :  { %v812_v55 = vadd.f32 %v811_v52, %v810_v49  ;;  %v1270_v56 = vpop.f32.mrf.mxu0  ;;  %v833_v38 = vsel %vm736_vm2, %v718_v43, 0.0  ;;  %v618_v52 = vadd.f32 %v1706_v61, %v1627_v39  ;;  %v720_v53 = vmax.f32 %v610_v44, 0.0 }
 0x11f   :  { %v709_v60 = vmax.f32 %v565_v54, 0.0  ;;  %v586_v7 = vadd.f32 %v1270_v56, %v1627_v39  ;;  %v819_v12 = vsel %vm736_vm2, %v711_v0, 0.0  ;;  %v721_v56 = vmax.f32 %v613_v48, 0.0 }
 0x120   :  { %v814_v62 = vadd.f32 %v813_v59, %v812_v55  ;;  %v577_v63 = vpop.f32.mrf.mxu0  ;;  %v835_v55 = vsel %vm736_vm2, %v719_v47, 0.0  ;;  %v644_v59 = vpop.f32.mrf.mxu1  ;;  %v837_v32 = vsel %vm736_vm2, %v720_v53, 0.0  ;;  %v723_v0 = vmax.f32 %v621_v8, 0.0 }
 0x121   :  { %v815_v1 = vsel %vm736_vm2, %v709_v60, 0.0  ;;  %v578_v2 = vadd.f32 %v1627_v39, %v577_v63  ;;  %v714_v18 = vmax.f32 %v586_v7, 0.0  ;;  %v722_v60 = vmax.f32 %v618_v52, 0.0 }
 0x122   :  { %v816_v3 = vadd.f32 %v815_v1, %v814_v62  ;;  %v1271_v4 = vpop.f32.mrf.mxu0  ;;  %v626_v62 = vadd.f32 %v1627_v39, %v625_v57  ;;  %v839_v1 = vsel %vm736_vm2, %v721_v56, 0.0  ;;  %v629_v61 = vadd.f32 %v1627_v39, %v628_v17 }
 0x123   :  { %v712_v9 = vmax.f32 %v578_v2, 0.0  ;;  %v589_v13 = vadd.f32 %v1271_v4, %v1627_v39  ;;  %v825_v31 = vsel %vm736_vm2, %v714_v18, 0.0  ;;  %v841_v4 = vsel %vm736_vm2, %v722_v60, 0.0 }
 0x124   :  { %v818_v10 = vadd.f32 %v817_v6, %v816_v3  ;;  %v580_v11 = vpop.f32.mrf.mxu0  ;;  %v1290_v3 = vpop.f32.mrf.mxu1  ;;  %v634_v20 = vadd.f32 %v1732_v45, %v1627_v39  ;;  %v724_v6 = vmax.f32 %v626_v62, 0.0  ;;  %v725_v57 = vmax.f32 %v629_v61, 0.0 }
 0x125   :  { %v581_v14 = vadd.f32 %v1627_v39, %v580_v11  ;;  %v821_v19 = vsel %vm736_vm2, %v712_v9, 0.0  ;;  %v715_v24 = vmax.f32 %v589_v13, 0.0  ;;  %v843_v9 = vsel %vm736_vm2, %v723_v0, 0.0 }
 0x126   :  { %v820_v16 = vadd.f32 %v819_v12, %v818_v10  ;;  %v637_v10 = vadd.f32 %v1283_v5, %v1627_v39  ;;  %v657_v12 = vpop.f32.mrf.mxu1  ;;  %v726_v13 = vmax.f32 %v634_v20, 0.0  ;;  %v645_v45 = vadd.f32 %v1627_v39, %v644_v59 }
 0x127   :  { %v713_v22 = vmax.f32 %v581_v14, 0.0  ;;  %v827_v36 = vsel %vm736_vm2, %v715_v24, 0.0  ;;  %v845_v14 = vsel %vm736_vm2, %v724_v6, 0.0  ;;  %v650_v5 = vadd.f32 %v1286_v29, %v1627_v39 }
 0x128   :  { %v822_v23 = vadd.f32 %v821_v19, %v820_v16  ;;  %v642_v16 = vadd.f32 %v1627_v39, %v641_v42  ;;  %v727_v18 = vmax.f32 %v637_v10, 0.0  ;;  %v847_v19 = vsel %vm736_vm2, %v725_v57, 0.0  ;;  %v985_v10 = vld [vmem:[%s1885_s5 + $0x78] sm:$0xff]  ;;  %v984_v57 = vld [vmem:[%s1885_s5 + $0x70] sm:$0xff] }
 0x129   :  { %v823_v25 = vsel %vm736_vm2, %v713_v22, 0.0  ;;  %v1291_v22 = vpop.f32.mrf.mxu1  ;;  %v658_v26 = vadd.f32 %v1627_v39, %v657_v12  ;;  %v666_v44 = vadd.f32 %v1290_v3, %v1627_v39  ;;  %v800_v47 = vrot.slane %v1725_v30, 4  ;;  %v982_v12 = vld [vmem:[%s1885_s5 + $0x60] sm:$0xff] }
 0x12a   :  { %v824_v28 = vadd.f32 %v823_v25, %v822_v23  ;;  %v849_v23 = vsel %vm736_vm2, %v726_v13, 0.0  ;;  %v728_v24 = vmax.f32 %v642_v16, 0.0  ;;  %v851_v27 = vsel %vm736_vm2, %v727_v18, 0.0  ;;  %v981_v13 = vld [vmem:[%s1885_s5 + $0x58] sm:$0xff]  ;;  %v979_v16 = vld [vmem:[%s1885_s5 + $0x48] sm:$0xff] }
 0x12b   :  { %v660_v34 = vpop.f32.mrf.mxu1  ;;  %v734_v52 = vmax.f32 %v666_v44, 0.0  ;;  %v977_v18 = vld [vmem:[%s1885_s5 + $0x38] sm:$0xff] }
 0x12c   :  { %v826_v35 = vadd.f32 %v825_v31, %v824_v28  ;;  %v653_v28 = vadd.f32 %v1287_v51, %v1627_v39  ;;  %v729_v31 = vmax.f32 %v645_v45, 0.0  ;;  %v661_v29 = vadd.f32 %v1627_v39, %v660_v34  ;;  %v975_v45 = vld [vmem:[%s1885_s5 + $0x28] sm:$0xff] }
 0x12d   :  { %v865_v59 = vsel %vm736_vm2, %v734_v52, 0.0 }
 0x12e   :  { %v828_v41 = vadd.f32 %v827_v36, %v826_v35  ;;  %v730_v35 = vmax.f32 %v650_v5, 0.0  ;;  %v853_v36 = vsel %vm736_vm2, %v728_v24, 0.0  ;;  %v855_v42 = vsel %vm736_vm2, %v729_v31, 0.0  ;;  %v971_v5 = vld [vmem:[%s1885_s5 + $0x8] sm:$0xff]  ;;  %v970_v24 = vld [vmem:[%s1885_s5] sm:$0xff] }
 0x12f   :  { %v733_v51 = vmax.f32 %v661_v29, 0.0 }
 0x130   :  { %v830_v46 = vadd.f32 %v829_v50, %v828_v41  ;;  %v731_v41 = vmax.f32 %v653_v28, 0.0  ;;  %v857_v50 = vsel %vm736_vm2, %v730_v35, 0.0 }
 0x131   :  { %v863_v56 = vsel %vm736_vm2, %v733_v51, 0.0 }
 0x132   :  { %v832_v49 = vadd.f32 %v831_v15, %v830_v46  ;;  %v732_v46 = vmax.f32 %v658_v26, 0.0  ;;  %v859_v48 = vsel %vm736_vm2, %v731_v41, 0.0 }
 0x134   :  { %v834_v54 = vadd.f32 %v833_v38, %v832_v49  ;;  %v669_v49 = vadd.f32 %v1291_v22, %v1627_v39  ;;  %v861_v53 = vsel %vm736_vm2, %v732_v46, 0.0  ;;  %v973_v22 = vld [vmem:[%s1885_s5 + $0x18] sm:$0xff] }
 0x136   :  { %v836_v58 = vadd.f32 %v835_v55, %v834_v54  ;;  %v801_v54 = vadd.f32 %v800_v47, %v1725_v30  ;;  %v735_v8 = vmax.f32 %v669_v49, 0.0 }
 0x138   :  { %v838_v63 = vadd.f32 %v837_v32, %v836_v58  ;;  %v802_v60 = vrot.slane %v801_v54, 2  ;;  %v867_v62 = vsel %vm736_vm2, %v735_v8, 0.0 }
 0x13a   :  { %v840_v2 = vadd.f32 %v839_v1, %v838_v63  ;;  %v803_v39 = vadd.f32 %v802_v60, %v801_v54 }
 0x13c   :  { %v842_v7 = vadd.f32 %v841_v4, %v840_v2  ;;  %v804_v61 = vrot.slane %v803_v39, 1 }
 0x13e   :  { %v844_v11 = vadd.f32 %v843_v9, %v842_v7  ;;  %v805_v30 = vadd.f32 %v804_v61, %v803_v39 }
 0x140   :  { %v846_v17 = vadd.f32 %v845_v14, %v844_v11  ;;  %v875_v6 = vmul.f32 0.00390625, %v805_v30  ;;  %v983_v11 = vld [vmem:[%s1885_s5 + $0x68] sm:$0xff]  ;;  %v980_v14 = vld [vmem:[%s1885_s5 + $0x50] sm:$0xff] }
 0x142   :  { %v848_v21 = vadd.f32 %v847_v19, %v846_v17  ;;  %v978_v17 = vld [vmem:[%s1885_s5 + $0x40] sm:$0xff]  ;;  %v976_v19 = vld [vmem:[%s1885_s5 + $0x30] sm:$0xff] }
 0x144   :  { %v850_v25 = vadd.f32 %v849_v23, %v848_v21  ;;  %v974_v21 = vld [vmem:[%s1885_s5 + $0x20] sm:$0xff]  ;;  %v972_v23 = vld [vmem:[%s1885_s5 + $0x10] sm:$0xff]  ;;  %s1389_s5 = scalar_lea.vmem %s1082_s21, 32 }
 0x145   :  { %p1390_p0 = scmp.ne.s32.totalorder %s1082_s21, %s1389_s5  ;;  %p1395_p2 = scmp.lt.s32.totalorder %s1389_s5, %s1389_s5 }
 0x146   :  { %v852_v33 = vadd.f32 %v851_v27, %v850_v25  ;;  %v1161_v25 = vld [vmem:[%s1884_s4] ss:$0 sm:$0xff] }
 0x147   :  { %p1396_p3 = por %p1395_p2, %p1394_p1 }
 0x148   :  { %v854_v40 = vadd.f32 %v853_v36, %v852_v33 }
 0x149   :  { %p1397_p4 = pnand %p1396_p3, %p1390_p0 }
 0x14a   :  { %v856_v43 = vadd.f32 %v855_v42, %v854_v40 }
 0x14c   :  { %v858_v15 = vadd.f32 %v857_v50, %v856_v43 }
 0x14e   :  { %v860_v38 = vadd.f32 %v859_v48, %v858_v15 }
 0x150   :  { %v862_v55 = vadd.f32 %v861_v53, %v860_v38 }
 0x152   :  { %v864_v58 = vadd.f32 %v863_v56, %v862_v55 }
 0x154   :  { %v866_v32 = vadd.f32 %v865_v59, %v864_v58 }
 0x156   :  { %v868_v63 = vadd.f32 %v867_v62, %v866_v32 }
 0x158   :  { %v869_v0 = vrot.slane %v868_v63, 4 }
 0x15a   :  { %v870_v1 = vadd.f32 %v869_v0, %v868_v63 }
 0x15c   :  { %v871_v2 = vrot.slane %v870_v1, 2 }
 0x15e   :  { %v872_v3 = vadd.f32 %v871_v2, %v870_v1 }
 0x160   :  { %v873_v4 = vrot.slane %v872_v3, 1 }
 0x162   :  { %v874_v20 = vadd.f32 %v873_v4, %v872_v3 }
 0x164   :  { %v876_v7 = vmul.f32 0.00390625, %v874_v20 }
 0x166   :  { %v891_v9 = vsel %vm890_vm4, %v876_v7, %v875_v6 }
 0x167   :  { %1301 = vmatmul.mubr.msk.f32.vlgmr.msra.gmra.mxu1 %vm736_vm2, %v891_v9 }
 0x168   :  { %1335 = vmatprep.mubr.msk.f32.mxu1 %vm1434_vm3, %v1433_v37  ;;  %1304 = vmatpush3.msra.mxu1 %v985_v10 }
 0x169   :  { %1305 = vmatprep.subr.mxu1 %v1433_v37 }
 0x16a   :  { %1306 = vmatpush3.msra.mxu1 %v984_v57 }
 0x16b   :  { %1307 = vmatprep.subr.mxu1 %v1433_v37 }
 0x16c   :  { %1308 = vmatpush3.msra.mxu1 %v983_v11 }
 0x16d   :  { %1309 = vmatprep.subr.mxu1 %v1433_v37 }
 0x16e   :  { %1310 = vmatpush3.msra.mxu1 %v982_v12 }
 0x16f   :  { %1311 = vmatprep.subr.mxu1 %v1433_v37 }
 0x170   :  { %1312 = vmatpush3.msra.mxu1 %v981_v13 }
 0x171   :  { %1313 = vmatprep.subr.mxu1 %v1433_v37 }
 0x172   :  { %1314 = vmatpush3.msra.mxu1 %v980_v14 }
 0x173   :  { %1315 = vmatprep.subr.mxu1 %v1433_v37 }
 0x174   :  { %1316 = vmatpush3.msra.mxu1 %v979_v16 }
 0x175   :  { %1317 = vmatprep.subr.mxu1 %v1433_v37 }
 0x176   :  { %1318 = vmatpush3.msra.mxu1 %v978_v17 }
 0x177   :  { %1319 = vmatprep.subr.mxu1 %v1433_v37 }
 0x178   :  { %1320 = vmatpush3.msra.mxu1 %v977_v18 }
 0x179   :  { %1321 = vmatprep.subr.mxu1 %v1433_v37 }
 0x17a   :  { %1322 = vmatpush3.msra.mxu1 %v976_v19 }
 0x17b   :  { %1323 = vmatprep.subr.mxu1 %v1433_v37 }
 0x17c   :  { %1324 = vmatpush3.msra.mxu1 %v975_v45 }
 0x17d   :  { %1325 = vmatprep.subr.mxu1 %v1433_v37 }
 0x17e   :  { %1326 = vmatpush3.msra.mxu1 %v974_v21 }
 0x17f   :  { %1327 = vmatprep.subr.mxu1 %v1433_v37 }
 0x180   :  { %1328 = vmatpush3.msra.mxu1 %v973_v22 }
 0x181   :  { %1329 = vmatprep.subr.mxu1 %v1433_v37 }
 0x182   :  { %1330 = vmatpush3.msra.mxu1 %v972_v23 }
 0x183   :  { %1331 = vmatprep.subr.mxu1 %v1433_v37 }
 0x184   :  { %1332 = vmatpush3.msra.mxu1 %v971_v5 }
 0x185   :  { %1333 = vmatprep.subr.mxu1 %v1433_v37 }
 0x186   :  { %1334 = vmatpush3.msra.mxu1 %v970_v24 }
 0x227   :  { %v960_v27 = vpop.f32.mrf.mxu1 }
 0x228   :  { %v961_v28 = vadd.f32 %v1161_v25, %v960_v27 }
 0x229   :  { %v1302_v31 = vpop.f32.mrf.mxu1 }
 0x22a   :  { %v1163_v33 = vmul.f32 -1.442695, %v961_v28 }
 0x22c   :  { %1385 = vpow2.f32 %v1163_v33 }
 0x239   :  { %v1386_v34 = vpop.eup %1385 }
 0x23a   :  { %v967_v35 = vadd.f32 1.0, %v1386_v34 }
 0x23c   :  { %1387 = vrcp.f32 %v967_v35 }
 0x249   :  { %v1388_v36 = vpop.eup %1387 }
 0x24a   :  { %1064 = vst [vmem:[#allocation4] sm:$0x3] %v1388_v36  ;;  %1336 = vmatmul.mubr.f32.vlgmr.msra.gmra.mxu1 %v1388_v36 }
 0x24b   :  { %1400 = shalt.err (!%p1397_p4)
}
 0x24c   :  { %1084 = dma.vmem_to_hbm [thread:$0]  %s1082_s21, 32, %s1888_s8, [#allocation5]   ;;  %v1164_v37 = vld [vmem:[%s1886_s6] ss:$0 sm:$0xff] }
 0x24d   :  { %s1436_s25 = smov [#allocation2]  }
 0x24e   :  { %s1071_s26 = sshll.u32 %s1436_s25, 4  ;;  %s1072_s26 = int_to_ptr.vmem [resolvable:$true] %s1071_s26 }
 0x24f   :  { %s1409_s27 = scalar_lea.vmem %s1072_s26, 32  ;;  %p1414_p6 = scmp.lt.s32.totalorder %s1072_s26, %s1072_s26 }
 0x250   :  { %p1410_p5 = scmp.ne.s32.totalorder %s1072_s26, %s1409_s27  ;;  %p1415_p7 = scmp.lt.s32.totalorder %s1409_s27, %s1409_s27 }
 0x252   :  { %p1416_p8 = por %p1415_p7, %p1414_p6 }
 0x254   :  { %p1417_p9 = pnand %p1416_p8, %p1410_p5 }
 0x30a   :  { %v1059_v26 = vpop.f32.mrf.mxu1 }
 0x30b   :  { %v1060_v40 = vadd.f32 %v1164_v37, %v1059_v26 }
 0x30c   :  { %v1337_v41 = vpop.f32.mrf.mxu1 }
 0x30d   :  { %1063 = vst [vmem:[#allocation2] sm:$0x3] %v1060_v40 }
 0x30e   :  { %1420 = shalt.err (!%p1417_p9)
}
 0x30f   :  { %1074 = dma.vmem_to_hbm [thread:$0]  %s1072_s26, 32, %s1887_s7, [#allocation3]  }
 0x310   :  { %1429 = dma.done.wait [#allocation3], 32  }
 0x311   :  { %1430 = vsyncadd [#allocation3], 4294967264 }
 0x312   :  { %1431 = dma.done.wait [#allocation5], 32  }
 0x313   :  { %1432 = vsyncadd [#allocation5], 4294967264 }
 0x314   :  { %1091 = vsyncpa [#allocation3], 1 }
 0x315   :  { %1092 = vsyncpa [#allocation5], 1 }

</bundles_post_ra>
